<compile_context>
chip_gen: v7x
topology: tpu7x:2x2x1
jax: 0.10.0
libtpu: 0.0.40
codegen_flags: <defaults>
</compile_context>

<pallas_src>
import functools

import jax
import jax.numpy as jnp
from jax.experimental import pallas as pl
from jax.experimental.pallas import tpu as pltpu


def _layer_norm(v, g, b, eps=1e-5):
    mu = jnp.mean(v, axis=-1, keepdims=True)
    var = jnp.mean((v - mu) ** 2, axis=-1, keepdims=True)
    return (v - mu) * jax.lax.rsqrt(var + eps) * g + b


# ----------------------------------------------------------------------------
# Kernel: one (batch row, ponder step) grid point
# ----------------------------------------------------------------------------
def _make_ponder_kernel(num_heads):
    def kernel(x0_ref, mask_ref,
               wqkv_ref, bqkv_ref, wo_ref, bo_ref,
               ln1g_ref, ln1b_ref, w1_ref, b1_ref, w2_ref, b2_ref,
               ln2g_ref, ln2b_ref, whead_ref, bhead_ref,
               y_ref, x_state):
        n = pl.program_id(1)
        num_steps = pl.num_programs(1)
        S, D = x_state.shape
        hd = D // num_heads

        # step 0 of each batch row: load embedded tokens into resident state.
        @pl.when(n == 0)
        def _init():
            x_state[...] = x0_ref[0]

        x = x_state[...]                           # (S, D) f32
        xb = x.astype(jnp.bfloat16)

        # fused output-head + halting-head: lane-dense (S, 128) store.
        y_ref[0, 0] = (jnp.dot(xb, whead_ref[...],
                               preferred_element_type=jnp.float32)
                       + bhead_ref[...])

        # transformer encoder block (post-LN MHA + ReLU FFN).
        # TODO(synk): the reference Transformer class is not shown in the spec;
        # a standard post-LN MHA + FFN encoder block with key-padding mask is
        # assumed. The last step's x update is never observed, so it is skipped.
        @pl.when(n < num_steps - 1)
        def _update():
            qkv = (jnp.dot(xb, wqkv_ref[...],
                           preferred_element_type=jnp.float32)
                   + bqkv_ref[...])                # (S, 3D) f32; Wq pre-scaled
            q = qkv[:, :D].astype(jnp.bfloat16)
            k = qkv[:, D:2 * D].astype(jnp.bfloat16)
            v = qkv[:, 2 * D:].astype(jnp.bfloat16)
            mask_b = mask_ref[0]                   # (1, S) additive key-pad bias

            ctx_heads = []
            for h in range(num_heads):
                qh = q[:, h * hd:(h + 1) * hd]
                kh = k[:, h * hd:(h + 1) * hd]
                vh = v[:, h * hd:(h + 1) * hd]
                s = jax.lax.dot_general(qh, kh, (((1,), (1,)), ((), ())),
                                        preferred_element_type=jnp.float32)
                # NOTE: rows whose keys are all padding end up with a uniform
                # softmax (max-subtraction rescues the all -1e9 row).
                s = s + mask_b
                s = s - jnp.max(s, axis=-1, keepdims=True)
                p = jnp.exp(s)
                p = p * pl.reciprocal(jnp.sum(p, axis=-1, keepdims=True),
                                      approx=True)
                ctx_heads.append(jnp.dot(p.astype(jnp.bfloat16), vh,
                                         preferred_element_type=jnp.float32))
            ctx = jnp.concatenate(ctx_heads, axis=-1)          # (S, D) f32

            attn_out = (jnp.dot(ctx.astype(jnp.bfloat16), wo_ref[...],
                                preferred_element_type=jnp.float32)
                        + bo_ref[...])
            h1 = _layer_norm(x + attn_out, ln1g_ref[...], ln1b_ref[...])
            ff = (jnp.dot(h1.astype(jnp.bfloat16), w1_ref[...],
                          preferred_element_type=jnp.float32) + b1_ref[...])
            ff = jnp.maximum(ff, 0.0)
            ff = (jnp.dot(ff.astype(jnp.bfloat16), w2_ref[...],
                          preferred_element_type=jnp.float32) + b2_ref[...])
            x_state[...] = _layer_norm(h1 + ff, ln2g_ref[...], ln2b_ref[...])

    return kernel


# ----------------------------------------------------------------------------
# pallas_call wrapper: whole ponder loop in one launch
# ----------------------------------------------------------------------------
def _full_spec(arr):
    nd = arr.ndim
    return pl.BlockSpec(arr.shape, lambda b, n, _nd=nd: (0,) * _nd)


def ponder_all_steps(x0, mask_bias, params, max_steps, num_heads):
    B, S, D = x0.shape
    tpad = params['w_head'].shape[1]

    weights = (params['wqkv'], params['bqkv'], params['wo'], params['bo'],
               params['ln1_g'], params['ln1_b'],
               params['w1'], params['b1'], params['w2'], params['b2'],
               params['ln2_g'], params['ln2_b'],
               params['w_head'], params['b_head'])

    in_specs = ([pl.BlockSpec((1, S, D), lambda b, n: (b, 0, 0)),
                 pl.BlockSpec((1, 1, S), lambda b, n: (b, 0, 0))]
                + [_full_spec(w) for w in weights])

    return pl.pallas_call(
        _make_ponder_kernel(num_heads),
        grid=(B, max_steps),
        in_specs=in_specs,
        out_specs=pl.BlockSpec((1, 1, S, tpad), lambda b, n: (n, b, 0, 0)),
        out_shape=jax.ShapeDtypeStruct((max_steps, B, S, tpad), jnp.float32),
        scratch_shapes=[pltpu.VMEM((S, D), jnp.float32)],
        compiler_params=pltpu.CompilerParams(
            dimension_semantics=("parallel", "arbitrary")),
    )(x0, mask_bias, *weights)


# ----------------------------------------------------------------------------
# Full PonderTransformer forward (glue in plain JAX)
# ----------------------------------------------------------------------------
@functools.partial(jax.jit, static_argnames=('max_steps', 'num_tokens',
                                             'num_heads', 'allow_halting'))
def ponder_transformer_forward(tokens, params, rng_key, *, max_steps,
                               num_tokens, num_heads, allow_halting=False):
    B, S = tokens.shape

    # key-padding mask (token id 0) as an additive bias, broadcast in-kernel.
    mask_bias = jnp.where(tokens == 0, -1e9, 0.0).astype(jnp.float32)
    mask_bias = mask_bias.reshape(B, 1, S)

    x0 = jnp.take(params['embedding'], tokens, axis=0).astype(jnp.float32)

    # (max_steps, B, S, 128): cols [0:T] = logits, col T = lambda logit.
    y_head = ponder_all_steps(x0, mask_bias, params, max_steps, num_heads)
    y = y_head[..., :num_tokens]

    lam = jax.nn.sigmoid(y_head[:, :, 0, num_tokens])   # (max_steps, B)
    lam = lam.at[max_steps - 1].set(1.0)                 # lambda_N forced to 1

    un_halted_before = jnp.concatenate(
        [jnp.ones((1, B), jnp.float32),
         jnp.cumprod(1.0 - lam, axis=0)[:-1]], axis=0)
    p = un_halted_before * lam                           # (max_steps, B)

    bern = jax.random.bernoulli(rng_key, lam)            # (max_steps, B)
    steps = jnp.arange(1, max_steps + 1, dtype=jnp.int32)[:, None]
    first = jnp.min(jnp.where(bern, steps, max_steps + 1), axis=0)
    halting_step = jnp.where(first > max_steps, 0, first).astype(jnp.int32)

    # TODO(synk): allow_halting early exit needs a data-dependent trip count
    # (host sync on (halting_step > 0).sum()); module default is False.
    del allow_halting
    return y, p, halting_step


# ----------------------------------------------------------------------------
# Deterministic synthetic parameter init (fused / padded weight layout)
# ----------------------------------------------------------------------------
def init_params(key, vocab_size, emb_dim, num_tokens, num_heads, ffn_dim,
                head_pad=128):
    D = emb_dim
    hd = D // num_heads
    ks = jax.random.split(key, 20)
    dense = lambda k, shape, s=0.02: (s * jax.random.normal(k, shape)).astype(jnp.float32)

    # attention projections fused to (D, 3D); 1/sqrt(head_dim) folded into Q.
    scale = 1.0 / float(hd) ** 0.5
    wq = dense(ks[1], (D, D)) * scale
    bq = dense(ks[2], (D,)) * scale
    wk = dense(ks[3], (D, D)); bk = dense(ks[4], (D,))
    wv = dense(ks[5], (D, D)); bv = dense(ks[6], (D,))
    wqkv = jnp.concatenate([wq, wk, wv], axis=1)
    bqkv = jnp.concatenate([bq, bk, bv])[None, :]

    # output head (D, T) + halting head (D, 1), fused and lane-padded to 128.
    wout = dense(ks[13], (D, num_tokens)); bout = dense(ks[14], (num_tokens,))
    wl = dense(ks[15], (D, 1)); bl = dense(ks[16], (1,))
    w_head = jnp.zeros((D, head_pad), jnp.float32)
    w_head = w_head.at[:, :num_tokens].set(wout).at[:, num_tokens].set(wl[:, 0])
    b_head = jnp.zeros((1, head_pad), jnp.float32)
    b_head = b_head.at[0, :num_tokens].set(bout).at[0, num_tokens].set(bl[0])

    bf16 = jnp.bfloat16
    return {
        'embedding': dense(ks[0], (vocab_size, D), 1.0),
        'wqkv': wqkv.astype(bf16), 'bqkv': bqkv,
        'wo': dense(ks[7], (D, D)).astype(bf16), 'bo': dense(ks[8], (D,))[None, :],
        'ln1_g': jnp.ones((1, D), jnp.float32), 'ln1_b': jnp.zeros((1, D), jnp.float32),
        'w1': dense(ks[9], (D, ffn_dim)).astype(bf16), 'b1': dense(ks[10], (ffn_dim,))[None, :],
        'w2': dense(ks[11], (ffn_dim, D)).astype(bf16), 'b2': dense(ks[12], (D,))[None, :],
        'ln2_g': jnp.ones((1, D), jnp.float32), 'ln2_b': jnp.zeros((1, D), jnp.float32),
        'w_head': w_head.astype(bf16), 'b_head': b_head,
    }


# ----------------------------------------------------------------------------
if __name__ == "__main__":
    VOCAB, EMB, HEADS, FFN = 16, 32, 4, 128
    NUM_TOKENS, MAX_STEPS = 10, 4
    B, S = 2, 8

    root = jax.random.PRNGKey(0)
    k_param, k_tok, k_halt = jax.random.split(root, 3)

    params = init_params(k_param, VOCAB, EMB, NUM_TOKENS, HEADS, FFN)
    tokens = jax.random.randint(k_tok, (B, S), 0, VOCAB, dtype=jnp.int32)

    y, p, halting_step = ponder_transformer_forward(
        tokens, params, k_halt,
        max_steps=MAX_STEPS, num_tokens=NUM_TOKENS, num_heads=HEADS,
        allow_halting=False)

    jax.block_until_ready((y, p, halting_step))
    assert y.shape == (MAX_STEPS, B, S, NUM_TOKENS)
    assert p.shape == (MAX_STEPS, B)
    assert halting_step.shape == (B,)
    assert bool(jnp.all(jnp.isfinite(y)))
    assert bool(jnp.all(p >= 0.0))
    assert bool(jnp.all((halting_step >= 1) & (halting_step <= MAX_STEPS)))
    print("KERNEL_OK")
</pallas_src>

<mosaic_0001>
module attributes {stable_mosaic.version = 11 : i64} {
  func.func @kernel(%arg0: i32, %arg1: i32, %arg2: memref<1x8x32xf32, #tpu.memory_space<vmem>>, %arg3: memref<1x1x8xf32, #tpu.memory_space<vmem>>, %arg4: memref<32x96xbf16, #tpu.memory_space<vmem>>, %arg5: memref<1x96xf32, #tpu.memory_space<vmem>>, %arg6: memref<32x32xbf16, #tpu.memory_space<vmem>>, %arg7: memref<1x32xf32, #tpu.memory_space<vmem>>, %arg8: memref<1x32xf32, #tpu.memory_space<vmem>>, %arg9: memref<1x32xf32, #tpu.memory_space<vmem>>, %arg10: memref<32x128xbf16, #tpu.memory_space<vmem>>, %arg11: memref<1x128xf32, #tpu.memory_space<vmem>>, %arg12: memref<128x32xbf16, #tpu.memory_space<vmem>>, %arg13: memref<1x32xf32, #tpu.memory_space<vmem>>, %arg14: memref<1x32xf32, #tpu.memory_space<vmem>>, %arg15: memref<1x32xf32, #tpu.memory_space<vmem>>, %arg16: memref<32x128xbf16, #tpu.memory_space<vmem>>, %arg17: memref<1x128xf32, #tpu.memory_space<vmem>>, %arg18: memref<1x1x8x128xf32, #tpu.memory_space<vmem>>, %arg19: memref<8x32xf32, #tpu.memory_space<vmem>>) attributes {dimension_semantics = [#tpu.dimension_semantics<parallel>, #tpu.dimension_semantics<arbitrary>], iteration_bounds = array<i64: 2, 4>, scalar_prefetch = 0 : i64, scratch_operands = 1 : i64, tpu.core_type = #tpu.core_type<tc>, window_params = [{transform_indices = @transform_0, window_bounds = array<i64: 1, 8, 32>}, {transform_indices = @transform_1, window_bounds = array<i64: 1, 1, 8>}, {pipeline_mode = #tpu.pipeline_mode<synchronous>, transform_indices = @transform_2, window_bounds = array<i64: 32, 96>}, {pipeline_mode = #tpu.pipeline_mode<synchronous>, transform_indices = @transform_3, window_bounds = array<i64: 1, 96>}, {pipeline_mode = #tpu.pipeline_mode<synchronous>, transform_indices = @transform_4, window_bounds = array<i64: 32, 32>}, {pipeline_mode = #tpu.pipeline_mode<synchronous>, transform_indices = @transform_5, window_bounds = array<i64: 1, 32>}, {pipeline_mode = #tpu.pipeline_mode<synchronous>, transform_indices = @transform_6, window_bounds = array<i64: 1, 32>}, {pipeline_mode = #tpu.pipeline_mode<synchronous>, transform_indices = @transform_7, window_bounds = array<i64: 1, 32>}, {pipeline_mode = #tpu.pipeline_mode<synchronous>, transform_indices = @transform_8, window_bounds = array<i64: 32, 128>}, {pipeline_mode = #tpu.pipeline_mode<synchronous>, transform_indices = @transform_9, window_bounds = array<i64: 1, 128>}, {pipeline_mode = #tpu.pipeline_mode<synchronous>, transform_indices = @transform_10, window_bounds = array<i64: 128, 32>}, {pipeline_mode = #tpu.pipeline_mode<synchronous>, transform_indices = @transform_11, window_bounds = array<i64: 1, 32>}, {pipeline_mode = #tpu.pipeline_mode<synchronous>, transform_indices = @transform_12, window_bounds = array<i64: 1, 32>}, {pipeline_mode = #tpu.pipeline_mode<synchronous>, transform_indices = @transform_13, window_bounds = array<i64: 1, 32>}, {pipeline_mode = #tpu.pipeline_mode<synchronous>, transform_indices = @transform_14, window_bounds = array<i64: 32, 128>}, {pipeline_mode = #tpu.pipeline_mode<synchronous>, transform_indices = @transform_15, window_bounds = array<i64: 1, 128>}, {transform_indices = @transform_16, window_bounds = array<i64: 1, 1, 8, 128>}]} {
    %c0_i32 = arith.constant 0 : i32
    %0 = arith.cmpi eq, %arg1, %c0_i32 : i32
    %1 = arith.extui %0 : i1 to i32
    %c0_i32_0 = arith.constant 0 : i32
    %2 = arith.cmpi ne, %1, %c0_i32_0 : i32
    scf.if %2 {
      %c0_11 = arith.constant 0 : index
      %c0_12 = arith.constant 0 : index
      %c0_13 = arith.constant 0 : index
      %16 = vector.load %arg2[%c0_11, %c0_12, %c0_13] : memref<1x8x32xf32, #tpu.memory_space<vmem>>, vector<1x8x32xf32>
      %17 = vector.shape_cast %16 : vector<1x8x32xf32> to vector<8x32xf32>
      %c0_14 = arith.constant 0 : index
      %c0_15 = arith.constant 0 : index
      %18 = vector.load %arg19[%c0_14, %c0_15] : memref<8x32xf32, #tpu.memory_space<vmem>>, vector<8x32xf32>
      tpu.vector_store %arg19[%c0_14, %c0_15], %17 {strides = array<i32>} : memref<8x32xf32, #tpu.memory_space<vmem>>, vector<8x32xf32>,
    } else {
    }
    %c0 = arith.constant 0 : index
    %c0_1 = arith.constant 0 : index
    %3 = vector.load %arg19[%c0, %c0_1] : memref<8x32xf32, #tpu.memory_space<vmem>>, vector<8x32xf32>
    %4 = arith.truncf %3 : vector<8x32xf32> to vector<8x32xbf16>
    %c0_2 = arith.constant 0 : index
    %c0_3 = arith.constant 0 : index
    %5 = vector.load %arg16[%c0_2, %c0_3] : memref<32x128xbf16, #tpu.memory_space<vmem>>, vector<32x128xbf16>
    %cst = arith.constant dense<0.000000e+00> : vector<8x128xf32>
    %6 = tpu.matmul %4, %5, %cst {dimension_numbers = #tpu.dot_dimension_numbers<[1], [0], [0], [1], [0, 0, 1, 1], [], []>} : vector<8x32xbf16>, vector<32x128xbf16>, vector<8x128xf32> -> vector<8x128xf32>
    %c0_4 = arith.constant 0 : index
    %c0_5 = arith.constant 0 : index
    %7 = vector.load %arg17[%c0_4, %c0_5] : memref<1x128xf32, #tpu.memory_space<vmem>>, vector<1x128xf32>
    %8 = vector.broadcast %7 : vector<1x128xf32> to vector<8x128xf32>
    %9 = arith.addf %6, %8 : vector<8x128xf32>
    %c0_6 = arith.constant 0 : index
    %c0_7 = arith.constant 0 : index
    %c0_8 = arith.constant 0 : index
    %c0_9 = arith.constant 0 : index
    %10 = vector.load %arg18[%c0_6, %c0_7, %c0_8, %c0_9] : memref<1x1x8x128xf32, #tpu.memory_space<vmem>>, vector<1x1x8x128xf32>
    %11 = vector.shape_cast %10 : vector<1x1x8x128xf32> to vector<8x128xf32>
    %12 = vector.shape_cast %9 : vector<8x128xf32> to vector<1x1x8x128xf32>
    tpu.vector_store %arg18[%c0_6, %c0_7, %c0_8, %c0_9], %12 {strides = array<i32>} : memref<1x1x8x128xf32, #tpu.memory_space<vmem>>, vector<1x1x8x128xf32>,
    %c3_i32 = arith.constant 3 : i32
    %13 = arith.cmpi slt, %arg1, %c3_i32 : i32
    %14 = arith.extui %13 : i1 to i32
    %c0_i32_10 = arith.constant 0 : i32
    %15 = arith.cmpi ne, %14, %c0_i32_10 : i32
    scf.if %15 {
      %c0_11 = arith.constant 0 : index
      %c0_12 = arith.constant 0 : index
      %16 = vector.load %arg4[%c0_11, %c0_12] : memref<32x96xbf16, #tpu.memory_space<vmem>>, vector<32x96xbf16>
      %cst_13 = arith.constant dense<0.000000e+00> : vector<8x96xf32>
      %17 = tpu.matmul %4, %16, %cst_13 {dimension_numbers = #tpu.dot_dimension_numbers<[1], [0], [0], [1], [0, 0, 1, 1], [], []>} : vector<8x32xbf16>, vector<32x96xbf16>, vector<8x96xf32> -> vector<8x96xf32>
      %c0_14 = arith.constant 0 : index
      %c0_15 = arith.constant 0 : index
      %18 = vector.load %arg5[%c0_14, %c0_15] : memref<1x96xf32, #tpu.memory_space<vmem>>, vector<1x96xf32>
      %19 = vector.broadcast %18 : vector<1x96xf32> to vector<8x96xf32>
      %20 = arith.addf %17, %19 : vector<8x96xf32>
      %21 = vector.extract_strided_slice %20 {offsets = [0, 0], sizes = [8, 32], strides = [1, 1]} : vector<8x96xf32> to vector<8x32xf32>
      %22 = arith.truncf %21 : vector<8x32xf32> to vector<8x32xbf16>
      %23 = vector.extract_strided_slice %20 {offsets = [0, 32], sizes = [8, 32], strides = [1, 1]} : vector<8x96xf32> to vector<8x32xf32>
      %24 = arith.truncf %23 : vector<8x32xf32> to vector<8x32xbf16>
      %25 = vector.extract_strided_slice %20 {offsets = [0, 64], sizes = [8, 32], strides = [1, 1]} : vector<8x96xf32> to vector<8x32xf32>
      %26 = arith.truncf %25 : vector<8x32xf32> to vector<8x32xbf16>
      %c0_16 = arith.constant 0 : index
      %c0_17 = arith.constant 0 : index
      %c0_18 = arith.constant 0 : index
      %27 = vector.load %arg3[%c0_16, %c0_17, %c0_18] : memref<1x1x8xf32, #tpu.memory_space<vmem>>, vector<1x1x8xf32>
      %28 = vector.shape_cast %27 : vector<1x1x8xf32> to vector<1x8xf32>
      %29 = vector.extract_strided_slice %22 {offsets = [0, 0], sizes = [8, 8], strides = [1, 1]} : vector<8x32xbf16> to vector<8x8xbf16>
      %30 = vector.extract_strided_slice %24 {offsets = [0, 0], sizes = [8, 8], strides = [1, 1]} : vector<8x32xbf16> to vector<8x8xbf16>
      %31 = vector.extract_strided_slice %26 {offsets = [0, 0], sizes = [8, 8], strides = [1, 1]} : vector<8x32xbf16> to vector<8x8xbf16>
      %cst_19 = arith.constant dense<0.000000e+00> : vector<8x8xf32>
      %32 = tpu.matmul %29, %30, %cst_19 {dimension_numbers = #tpu.dot_dimension_numbers<[1], [1], [0], [0], [0, 0, 1, 0], [], []>} : vector<8x8xbf16>, vector<8x8xbf16>, vector<8x8xf32> -> vector<8x8xf32>
      %33 = vector.broadcast %28 : vector<1x8xf32> to vector<8x8xf32>
      %34 = arith.addf %32, %33 : vector<8x8xf32>
      %cst_20 = arith.constant dense<0xFF800000> : vector<8xf32>
      %35 = vector.multi_reduction <maximumf>, %34, %cst_20 [1] : vector<8x8xf32> to vector<8xf32>
      %36 = vector.shape_cast %35 : vector<8xf32> to vector<8x1xf32>
      %37 = vector.broadcast %36 : vector<8x1xf32> to vector<8x8xf32>
      %38 = arith.subf %34, %37 : vector<8x8xf32>
      %39 = math.exp %38 : vector<8x8xf32>
      %cst_21 = arith.constant dense<0.000000e+00> : vector<8xf32>
      %40 = vector.multi_reduction <add>, %39, %cst_21 [1] : vector<8x8xf32> to vector<8xf32>
      %41 = vector.shape_cast %40 : vector<8xf32> to vector<8x1xf32>
      %42 = tpu.reciprocal %41 {approx = true} : vector<8x1xf32> -> vector<8x1xf32>
      %43 = vector.broadcast %42 : vector<8x1xf32> to vector<8x8xf32>
      %44 = arith.mulf %39, %43 : vector<8x8xf32>
      %45 = arith.truncf %44 : vector<8x8xf32> to vector<8x8xbf16>
      %cst_22 = arith.constant dense<0.000000e+00> : vector<8x8xf32>
      %46 = tpu.matmul %45, %31, %cst_22 {dimension_numbers = #tpu.dot_dimension_numbers<[1], [0], [0], [1], [0, 0, 1, 1], [], []>} : vector<8x8xbf16>, vector<8x8xbf16>, vector<8x8xf32> -> vector<8x8xf32>
      %47 = vector.extract_strided_slice %22 {offsets = [0, 8], sizes = [8, 8], strides = [1, 1]} : vector<8x32xbf16> to vector<8x8xbf16>
      %48 = vector.extract_strided_slice %24 {offsets = [0, 8], sizes = [8, 8], strides = [1, 1]} : vector<8x32xbf16> to vector<8x8xbf16>
      %49 = vector.extract_strided_slice %26 {offsets = [0, 8], sizes = [8, 8], strides = [1, 1]} : vector<8x32xbf16> to vector<8x8xbf16>
      %cst_23 = arith.constant dense<0.000000e+00> : vector<8x8xf32>
      %50 = tpu.matmul %47, %48, %cst_23 {dimension_numbers = #tpu.dot_dimension_numbers<[1], [1], [0], [0], [0, 0, 1, 0], [], []>} : vector<8x8xbf16>, vector<8x8xbf16>, vector<8x8xf32> -> vector<8x8xf32>
      %51 = vector.broadcast %28 : vector<1x8xf32> to vector<8x8xf32>
      %52 = arith.addf %50, %51 : vector<8x8xf32>
      %cst_24 = arith.constant dense<0xFF800000> : vector<8xf32>
      %53 = vector.multi_reduction <maximumf>, %52, %cst_24 [1] : vector<8x8xf32> to vector<8xf32>
      %54 = vector.shape_cast %53 : vector<8xf32> to vector<8x1xf32>
      %55 = vector.broadcast %54 : vector<8x1xf32> to vector<8x8xf32>
      %56 = arith.subf %52, %55 : vector<8x8xf32>
      %57 = math.exp %56 : vector<8x8xf32>
      %cst_25 = arith.constant dense<0.000000e+00> : vector<8xf32>
      %58 = vector.multi_reduction <add>, %57, %cst_25 [1] : vector<8x8xf32> to vector<8xf32>
      %59 = vector.shape_cast %58 : vector<8xf32> to vector<8x1xf32>
      %60 = tpu.reciprocal %59 {approx = true} : vector<8x1xf32> -> vector<8x1xf32>
      %61 = vector.broadcast %60 : vector<8x1xf32> to vector<8x8xf32>
      %62 = arith.mulf %57, %61 : vector<8x8xf32>
      %63 = arith.truncf %62 : vector<8x8xf32> to vector<8x8xbf16>
      %cst_26 = arith.constant dense<0.000000e+00> : vector<8x8xf32>
      %64 = tpu.matmul %63, %49, %cst_26 {dimension_numbers = #tpu.dot_dimension_numbers<[1], [0], [0], [1], [0, 0, 1, 1], [], []>} : vector<8x8xbf16>, vector<8x8xbf16>, vector<8x8xf32> -> vector<8x8xf32>
      %65 = vector.extract_strided_slice %22 {offsets = [0, 16], sizes = [8, 8], strides = [1, 1]} : vector<8x32xbf16> to vector<8x8xbf16>
      %66 = vector.extract_strided_slice %24 {offsets = [0, 16], sizes = [8, 8], strides = [1, 1]} : vector<8x32xbf16> to vector<8x8xbf16>
      %67 = vector.extract_strided_slice %26 {offsets = [0, 16], sizes = [8, 8], strides = [1, 1]} : vector<8x32xbf16> to vector<8x8xbf16>
      %cst_27 = arith.constant dense<0.000000e+00> : vector<8x8xf32>
      %68 = tpu.matmul %65, %66, %cst_27 {dimension_numbers = #tpu.dot_dimension_numbers<[1], [1], [0], [0], [0, 0, 1, 0], [], []>} : vector<8x8xbf16>, vector<8x8xbf16>, vector<8x8xf32> -> vector<8x8xf32>
      %69 = vector.broadcast %28 : vector<1x8xf32> to vector<8x8xf32>
      %70 = arith.addf %68, %69 : vector<8x8xf32>
      %cst_28 = arith.constant dense<0xFF800000> : vector<8xf32>
      %71 = vector.multi_reduction <maximumf>, %70, %cst_28 [1] : vector<8x8xf32> to vector<8xf32>
      %72 = vector.shape_cast %71 : vector<8xf32> to vector<8x1xf32>
      %73 = vector.broadcast %72 : vector<8x1xf32> to vector<8x8xf32>
      %74 = arith.subf %70, %73 : vector<8x8xf32>
      %75 = math.exp %74 : vector<8x8xf32>
      %cst_29 = arith.constant dense<0.000000e+00> : vector<8xf32>
      %76 = vector.multi_reduction <add>, %75, %cst_29 [1] : vector<8x8xf32> to vector<8xf32>
      %77 = vector.shape_cast %76 : vector<8xf32> to vector<8x1xf32>
      %78 = tpu.reciprocal %77 {approx = true} : vector<8x1xf32> -> vector<8x1xf32>
      %79 = vector.broadcast %78 : vector<8x1xf32> to vector<8x8xf32>
      %80 = arith.mulf %75, %79 : vector<8x8xf32>
      %81 = arith.truncf %80 : vector<8x8xf32> to vector<8x8xbf16>
      %cst_30 = arith.constant dense<0.000000e+00> : vector<8x8xf32>
      %82 = tpu.matmul %81, %67, %cst_30 {dimension_numbers = #tpu.dot_dimension_numbers<[1], [0], [0], [1], [0, 0, 1, 1], [], []>} : vector<8x8xbf16>, vector<8x8xbf16>, vector<8x8xf32> -> vector<8x8xf32>
      %83 = vector.extract_strided_slice %22 {offsets = [0, 24], sizes = [8, 8], strides = [1, 1]} : vector<8x32xbf16> to vector<8x8xbf16>
      %84 = vector.extract_strided_slice %24 {offsets = [0, 24], sizes = [8, 8], strides = [1, 1]} : vector<8x32xbf16> to vector<8x8xbf16>
      %85 = vector.extract_strided_slice %26 {offsets = [0, 24], sizes = [8, 8], strides = [1, 1]} : vector<8x32xbf16> to vector<8x8xbf16>
      %cst_31 = arith.constant dense<0.000000e+00> : vector<8x8xf32>
      %86 = tpu.matmul %83, %84, %cst_31 {dimension_numbers = #tpu.dot_dimension_numbers<[1], [1], [0], [0], [0, 0, 1, 0], [], []>} : vector<8x8xbf16>, vector<8x8xbf16>, vector<8x8xf32> -> vector<8x8xf32>
      %87 = vector.broadcast %28 : vector<1x8xf32> to vector<8x8xf32>
      %88 = arith.addf %86, %87 : vector<8x8xf32>
      %cst_32 = arith.constant dense<0xFF800000> : vector<8xf32>
      %89 = vector.multi_reduction <maximumf>, %88, %cst_32 [1] : vector<8x8xf32> to vector<8xf32>
      %90 = vector.shape_cast %89 : vector<8xf32> to vector<8x1xf32>
      %91 = vector.broadcast %90 : vector<8x1xf32> to vector<8x8xf32>
      %92 = arith.subf %88, %91 : vector<8x8xf32>
      %93 = math.exp %92 : vector<8x8xf32>
      %cst_33 = arith.constant dense<0.000000e+00> : vector<8xf32>
      %94 = vector.multi_reduction <add>, %93, %cst_33 [1] : vector<8x8xf32> to vector<8xf32>
      %95 = vector.shape_cast %94 : vector<8xf32> to vector<8x1xf32>
      %96 = tpu.reciprocal %95 {approx = true} : vector<8x1xf32> -> vector<8x1xf32>
      %97 = vector.broadcast %96 : vector<8x1xf32> to vector<8x8xf32>
      %98 = arith.mulf %93, %97 : vector<8x8xf32>
      %99 = arith.truncf %98 : vector<8x8xf32> to vector<8x8xbf16>
      %cst_34 = arith.constant dense<0.000000e+00> : vector<8x8xf32>
      %100 = tpu.matmul %99, %85, %cst_34 {dimension_numbers = #tpu.dot_dimension_numbers<[1], [0], [0], [1], [0, 0, 1, 1], [], []>} : vector<8x8xbf16>, vector<8x8xbf16>, vector<8x8xf32> -> vector<8x8xf32>
      %101 = tpu.concatenate %46, %64, %82, %100 in 1 : vector<8x8xf32>, vector<8x8xf32>, vector<8x8xf32>, vector<8x8xf32> -> vector<8x32xf32>
      %102 = arith.truncf %101 : vector<8x32xf32> to vector<8x32xbf16>
      %c0_35 = arith.constant 0 : index
      %c0_36 = arith.constant 0 : index
      %103 = vector.load %arg6[%c0_35, %c0_36] : memref<32x32xbf16, #tpu.memory_space<vmem>>, vector<32x32xbf16>
      %cst_37 = arith.constant dense<0.000000e+00> : vector<8x32xf32>
      %104 = tpu.matmul %102, %103, %cst_37 {dimension_numbers = #tpu.dot_dimension_numbers<[1], [0], [0], [1], [0, 0, 1, 1], [], []>} : vector<8x32xbf16>, vector<32x32xbf16>, vector<8x32xf32> -> vector<8x32xf32>
      %c0_38 = arith.constant 0 : index
      %c0_39 = arith.constant 0 : index
      %105 = vector.load %arg7[%c0_38, %c0_39] : memref<1x32xf32, #tpu.memory_space<vmem>>, vector<1x32xf32>
      %106 = vector.broadcast %105 : vector<1x32xf32> to vector<8x32xf32>
      %107 = arith.addf %104, %106 : vector<8x32xf32>
      %108 = arith.addf %3, %107 : vector<8x32xf32>
      %c0_40 = arith.constant 0 : index
      %c0_41 = arith.constant 0 : index
      %109 = vector.load %arg8[%c0_40, %c0_41] : memref<1x32xf32, #tpu.memory_space<vmem>>, vector<1x32xf32>
      %c0_42 = arith.constant 0 : index
      %c0_43 = arith.constant 0 : index
      %110 = vector.load %arg9[%c0_42, %c0_43] : memref<1x32xf32, #tpu.memory_space<vmem>>, vector<1x32xf32>
      %cst_44 = arith.constant dense<0.000000e+00> : vector<8xf32>
      %111 = vector.multi_reduction <add>, %108, %cst_44 [1] : vector<8x32xf32> to vector<8xf32>
      %112 = vector.shape_cast %111 : vector<8xf32> to vector<8x1xf32>
      %cst_45 = arith.constant 3.200000e+01 : f32
      %113 = vector.broadcast %cst_45 : f32 to vector<8x1xf32>
      %114 = arith.divf %112, %113 : vector<8x1xf32>
      %115 = vector.broadcast %114 : vector<8x1xf32> to vector<8x32xf32>
      %116 = arith.subf %108, %115 : vector<8x32xf32>
      %117 = arith.mulf %116, %116 : vector<8x32xf32>
      %cst_46 = arith.constant dense<0.000000e+00> : vector<8xf32>
      %118 = vector.multi_reduction <add>, %117, %cst_46 [1] : vector<8x32xf32> to vector<8xf32>
      %119 = vector.shape_cast %118 : vector<8xf32> to vector<8x1xf32>
      %cst_47 = arith.constant 3.200000e+01 : f32
      %120 = vector.broadcast %cst_47 : f32 to vector<8x1xf32>
      %121 = arith.divf %119, %120 : vector<8x1xf32>
      %122 = vector.broadcast %114 : vector<8x1xf32> to vector<8x32xf32>
      %123 = arith.subf %108, %122 : vector<8x32xf32>
      %cst_48 = arith.constant 9.99999974E-6 : f32
      %124 = vector.broadcast %cst_48 : f32 to vector<8x1xf32>
      %125 = arith.addf %121, %124 : vector<8x1xf32>
      %126 = math.rsqrt %125 : vector<8x1xf32>
      %127 = vector.broadcast %126 : vector<8x1xf32> to vector<8x32xf32>
      %128 = arith.mulf %123, %127 : vector<8x32xf32>
      %129 = vector.broadcast %109 : vector<1x32xf32> to vector<8x32xf32>
      %130 = arith.mulf %128, %129 : vector<8x32xf32>
      %131 = vector.broadcast %110 : vector<1x32xf32> to vector<8x32xf32>
      %132 = arith.addf %130, %131 : vector<8x32xf32>
      %133 = arith.truncf %132 : vector<8x32xf32> to vector<8x32xbf16>
      %c0_49 = arith.constant 0 : index
      %c0_50 = arith.constant 0 : index
      %134 = vector.load %arg10[%c0_49, %c0_50] : memref<32x128xbf16, #tpu.memory_space<vmem>>, vector<32x128xbf16>
      %cst_51 = arith.constant dense<0.000000e+00> : vector<8x128xf32>
      %135 = tpu.matmul %133, %134, %cst_51 {dimension_numbers = #tpu.dot_dimension_numbers<[1], [0], [0], [1], [0, 0, 1, 1], [], []>} : vector<8x32xbf16>, vector<32x128xbf16>, vector<8x128xf32> -> vector<8x128xf32>
      %c0_52 = arith.constant 0 : index
      %c0_53 = arith.constant 0 : index
      %136 = vector.load %arg11[%c0_52, %c0_53] : memref<1x128xf32, #tpu.memory_space<vmem>>, vector<1x128xf32>
      %137 = vector.broadcast %136 : vector<1x128xf32> to vector<8x128xf32>
      %138 = arith.addf %135, %137 : vector<8x128xf32>
      %cst_54 = arith.constant 0.000000e+00 : f32
      %139 = vector.broadcast %cst_54 : f32 to vector<8x128xf32>
      %140 = arith.maximumf %138, %139 : vector<8x128xf32>
      %141 = arith.truncf %140 : vector<8x128xf32> to vector<8x128xbf16>
      %c0_55 = arith.constant 0 : index
      %c0_56 = arith.constant 0 : index
      %142 = vector.load %arg12[%c0_55, %c0_56] : memref<128x32xbf16, #tpu.memory_space<vmem>>, vector<128x32xbf16>
      %cst_57 = arith.constant dense<0.000000e+00> : vector<8x32xf32>
      %143 = tpu.matmul %141, %142, %cst_57 {dimension_numbers = #tpu.dot_dimension_numbers<[1], [0], [0], [1], [0, 0, 1, 1], [], []>} : vector<8x128xbf16>, vector<128x32xbf16>, vector<8x32xf32> -> vector<8x32xf32>
      %c0_58 = arith.constant 0 : index
      %c0_59 = arith.constant 0 : index
      %144 = vector.load %arg13[%c0_58, %c0_59] : memref<1x32xf32, #tpu.memory_space<vmem>>, vector<1x32xf32>
      %145 = vector.broadcast %144 : vector<1x32xf32> to vector<8x32xf32>
      %146 = arith.addf %143, %145 : vector<8x32xf32>
      %147 = arith.addf %132, %146 : vector<8x32xf32>
      %c0_60 = arith.constant 0 : index
      %c0_61 = arith.constant 0 : index
      %148 = vector.load %arg14[%c0_60, %c0_61] : memref<1x32xf32, #tpu.memory_space<vmem>>, vector<1x32xf32>
      %c0_62 = arith.constant 0 : index
      %c0_63 = arith.constant 0 : index
      %149 = vector.load %arg15[%c0_62, %c0_63] : memref<1x32xf32, #tpu.memory_space<vmem>>, vector<1x32xf32>
      %cst_64 = arith.constant dense<0.000000e+00> : vector<8xf32>
      %150 = vector.multi_reduction <add>, %147, %cst_64 [1] : vector<8x32xf32> to vector<8xf32>
      %151 = vector.shape_cast %150 : vector<8xf32> to vector<8x1xf32>
      %cst_65 = arith.constant 3.200000e+01 : f32
      %152 = vector.broadcast %cst_65 : f32 to vector<8x1xf32>
      %153 = arith.divf %151, %152 : vector<8x1xf32>
      %154 = vector.broadcast %153 : vector<8x1xf32> to vector<8x32xf32>
      %155 = arith.subf %147, %154 : vector<8x32xf32>
      %156 = arith.mulf %155, %155 : vector<8x32xf32>
      %cst_66 = arith.constant dense<0.000000e+00> : vector<8xf32>
      %157 = vector.multi_reduction <add>, %156, %cst_66 [1] : vector<8x32xf32> to vector<8xf32>
      %158 = vector.shape_cast %157 : vector<8xf32> to vector<8x1xf32>
      %cst_67 = arith.constant 3.200000e+01 : f32
      %159 = vector.broadcast %cst_67 : f32 to vector<8x1xf32>
      %160 = arith.divf %158, %159 : vector<8x1xf32>
      %161 = vector.broadcast %153 : vector<8x1xf32> to vector<8x32xf32>
      %162 = arith.subf %147, %161 : vector<8x32xf32>
      %cst_68 = arith.constant 9.99999974E-6 : f32
      %163 = vector.broadcast %cst_68 : f32 to vector<8x1xf32>
      %164 = arith.addf %160, %163 : vector<8x1xf32>
      %165 = math.rsqrt %164 : vector<8x1xf32>
      %166 = vector.broadcast %165 : vector<8x1xf32> to vector<8x32xf32>
      %167 = arith.mulf %162, %166 : vector<8x32xf32>
      %168 = vector.broadcast %148 : vector<1x32xf32> to vector<8x32xf32>
      %169 = arith.mulf %167, %168 : vector<8x32xf32>
      %170 = vector.broadcast %149 : vector<1x32xf32> to vector<8x32xf32>
      %171 = arith.addf %169, %170 : vector<8x32xf32>
      %c0_69 = arith.constant 0 : index
      %c0_70 = arith.constant 0 : index
      %172 = vector.load %arg19[%c0_69, %c0_70] : memref<8x32xf32, #tpu.memory_space<vmem>>, vector<8x32xf32>
      tpu.vector_store %arg19[%c0_69, %c0_70], %171 {strides = array<i32>} : memref<8x32xf32, #tpu.memory_space<vmem>>, vector<8x32xf32>,
    } else {
    }
    return
  }
  func.func @transform_0(%arg0: i32, %arg1: i32) -> (i32, i32, i32) {
    %c0_i32 = arith.constant 0 : i32
    %c0_i32_0 = arith.constant 0 : i32
    %c0_i32_1 = arith.constant 0 : i32
    return %arg0, %c0_i32, %c0_i32_0 : i32, i32, i32
  }
  func.func @transform_1(%arg0: i32, %arg1: i32) -> (i32, i32, i32) {
    %c0_i32 = arith.constant 0 : i32
    %c0_i32_0 = arith.constant 0 : i32
    %c0_i32_1 = arith.constant 0 : i32
    return %arg0, %c0_i32, %c0_i32_0 : i32, i32, i32
  }
  func.func @transform_2(%arg0: i32, %arg1: i32) -> (i32, i32) {
    %c0_i32 = arith.constant 0 : i32
    %c0_i32_0 = arith.constant 0 : i32
    %c0_i32_1 = arith.constant 0 : i32
    return %c0_i32, %c0_i32_0 : i32, i32
  }
  func.func @transform_3(%arg0: i32, %arg1: i32) -> (i32, i32) {
    %c0_i32 = arith.constant 0 : i32
    %c0_i32_0 = arith.constant 0 : i32
    %c0_i32_1 = arith.constant 0 : i32
    return %c0_i32, %c0_i32_0 : i32, i32
  }
  func.func @transform_4(%arg0: i32, %arg1: i32) -> (i32, i32) {
    %c0_i32 = arith.constant 0 : i32
    %c0_i32_0 = arith.constant 0 : i32
    %c0_i32_1 = arith.constant 0 : i32
    return %c0_i32, %c0_i32_0 : i32, i32
  }
  func.func @transform_5(%arg0: i32, %arg1: i32) -> (i32, i32) {
    %c0_i32 = arith.constant 0 : i32
    %c0_i32_0 = arith.constant 0 : i32
    %c0_i32_1 = arith.constant 0 : i32
    return %c0_i32, %c0_i32_0 : i32, i32
  }
  func.func @transform_6(%arg0: i32, %arg1: i32) -> (i32, i32) {
    %c0_i32 = arith.constant 0 : i32
    %c0_i32_0 = arith.constant 0 : i32
    %c0_i32_1 = arith.constant 0 : i32
    return %c0_i32, %c0_i32_0 : i32, i32
  }
  func.func @transform_7(%arg0: i32, %arg1: i32) -> (i32, i32) {
    %c0_i32 = arith.constant 0 : i32
    %c0_i32_0 = arith.constant 0 : i32
    %c0_i32_1 = arith.constant 0 : i32
    return %c0_i32, %c0_i32_0 : i32, i32
  }
  func.func @transform_8(%arg0: i32, %arg1: i32) -> (i32, i32) {
    %c0_i32 = arith.constant 0 : i32
    %c0_i32_0 = arith.constant 0 : i32
    %c0_i32_1 = arith.constant 0 : i32
    return %c0_i32, %c0_i32_0 : i32, i32
  }
  func.func @transform_9(%arg0: i32, %arg1: i32) -> (i32, i32) {
    %c0_i32 = arith.constant 0 : i32
    %c0_i32_0 = arith.constant 0 : i32
    %c0_i32_1 = arith.constant 0 : i32
    return %c0_i32, %c0_i32_0 : i32, i32
  }
  func.func @transform_10(%arg0: i32, %arg1: i32) -> (i32, i32) {
    %c0_i32 = arith.constant 0 : i32
    %c0_i32_0 = arith.constant 0 : i32
    %c0_i32_1 = arith.constant 0 : i32
    return %c0_i32, %c0_i32_0 : i32, i32
  }
  func.func @transform_11(%arg0: i32, %arg1: i32) -> (i32, i32) {
    %c0_i32 = arith.constant 0 : i32
    %c0_i32_0 = arith.constant 0 : i32
    %c0_i32_1 = arith.constant 0 : i32
    return %c0_i32, %c0_i32_0 : i32, i32
  }
  func.func @transform_12(%arg0: i32, %arg1: i32) -> (i32, i32) {
    %c0_i32 = arith.constant 0 : i32
    %c0_i32_0 = arith.constant 0 : i32
    %c0_i32_1 = arith.constant 0 : i32
    return %c0_i32, %c0_i32_0 : i32, i32
  }
  func.func @transform_13(%arg0: i32, %arg1: i32) -> (i32, i32) {
    %c0_i32 = arith.constant 0 : i32
    %c0_i32_0 = arith.constant 0 : i32
    %c0_i32_1 = arith.constant 0 : i32
    return %c0_i32, %c0_i32_0 : i32, i32
  }
  func.func @transform_14(%arg0: i32, %arg1: i32) -> (i32, i32) {
    %c0_i32 = arith.constant 0 : i32
    %c0_i32_0 = arith.constant 0 : i32
    %c0_i32_1 = arith.constant 0 : i32
    return %c0_i32, %c0_i32_0 : i32, i32
  }
  func.func @transform_15(%arg0: i32, %arg1: i32) -> (i32, i32) {
    %c0_i32 = arith.constant 0 : i32
    %c0_i32_0 = arith.constant 0 : i32
    %c0_i32_1 = arith.constant 0 : i32
    return %c0_i32, %c0_i32_0 : i32, i32
  }
  func.func @transform_16(%arg0: i32, %arg1: i32) -> (i32, i32, i32, i32) {
    %c0_i32 = arith.constant 0 : i32
    %c0_i32_0 = arith.constant 0 : i32
    %c0_i32_1 = arith.constant 0 : i32
    return %arg1, %arg0, %c0_i32, %c0_i32_0 : i32, i32, i32, i32
  }
}

</mosaic_0001>

<bundles_post_ra>
// kernel: ponder_transformer_forward.1
= control target key start
LH: loop header
LB: loop body
LE: loop exit
PB: predicated region body
PF: predicated region fallthrough
CT: control target
= control target key end

     0   :  { %s1986_s21 = smov 0   ;;  %s1988_s22 = smov 0   ;;  %s2230_s0 = inlined_call_operand.vmem [shape: f32[2,8,32], index: 0, kind: input, shape index: {}]   ;;  %s2231_s1 = inlined_call_operand.vmem [shape: f32[2,1,8], index: 1, kind: input, shape index: {}]   ;;  %s2232_s2 = inlined_call_operand.vmem [shape: bf16[32,96], index: 2, kind: input, shape index: {}]   ;;  %s2233_s3 = inlined_call_operand.vmem [shape: f32[1,96], index: 3, kind: input, shape index: {}]   ;;  %s2234_s4 = inlined_call_operand.vmem [shape: bf16[32,32], index: 4, kind: input, shape index: {}]   ;;  %s2235_s5 = inlined_call_operand.vmem [shape: f32[1,32], index: 5, kind: input, shape index: {}]   ;;  %s2236_s6 = inlined_call_operand.vmem [shape: f32[1,32], index: 6, kind: input, shape index: {}]   ;;  %s2237_s7 = inlined_call_operand.vmem [shape: f32[1,32], index: 7, kind: input, shape index: {}]   ;;  %s2238_s8 = inlined_call_operand.vmem [shape: bf16[32,128], index: 8, kind: input, shape index: {}]   ;;  %s2239_s9 = inlined_call_operand.vmem [shape: f32[1,128], index: 9, kind: input, shape index: {}]   ;;  %s2240_s10 = inlined_call_operand.vmem [shape: bf16[128,32], index: 10, kind: input, shape index: {}]   ;;  %s2241_s11 = inlined_call_operand.vmem [shape: f32[1,32], index: 11, kind: input, shape index: {}]   ;;  %s2242_s12 = inlined_call_operand.vmem [shape: f32[1,32], index: 12, kind: input, shape index: {}]   ;;  %s2243_s13 = inlined_call_operand.vmem [shape: f32[1,32], index: 13, kind: input, shape index: {}]   ;;  %s2244_s14 = inlined_call_operand.vmem [shape: bf16[32,128], index: 14, kind: input, shape index: {}]   ;;  %s2245_s15 = inlined_call_operand.vmem [shape: f32[1,128], index: 15, kind: input, shape index: {}]   ;;  %s2246_s16 = inlined_call_operand.vmem [shape: f32[4,2,8,128], index: 16, kind: output, shape index: {}]  }
   0x1   :  { %2250 = sst [smem:[#allocation8_spill]] %s2230_s0  ;;  %s1990_s23 = smov 0  }
   0x2   :  { %2251 = sst [smem:[#allocation9_spill]] %s2242_s12  ;;  %s1992_s24 = smov 0  }
   0x3   :  { %2252 = sst [smem:[#allocation10_spill]] %s2243_s13  ;;  %s1994_s25 = smov 0  }
   0x4 LB: > { %2253 = sst [smem:[#allocation3_spill]] %s1873_s23  ;;  %s35_s26 = sadd.s32 1, %s1873_s23  ;;  %s1881_s25 = sphi %s1994_s25, %s26_s25   ;;  %s1877_s24 = sphi %s1992_s24, %s2265_s24   ;;  %s1873_s23 = sphi %s1990_s23, %s2264_s23   ;;  %s1869_s22 = sphi %s1988_s22, %s2263_s22   ;;  %s1865_s21 = sphi %s1986_s21, %s2262_s21  }
   0x5   : > { %2254 = sst [smem:[#allocation4_spill]] %s1877_s24  ;;  %s38_s27 = sadd.s32 1, %s1877_s24 }
   0x6   : > { %2255 = sst [smem:[#allocation5_spill]] %s1881_s25  ;;  %p36_p0 = scmp.ge.s32.totalorder %s35_s26, 4 }
   0x7   : > { %p1566_p1 = scmp.ge.s32.totalorder %s1881_s25, 1  ;;  %p483_p2 = scmp.lt.s32.totalorder %s1881_s25, 9 }
   0x8   : > { %s2267_s26 = smov (%p36_p0, %s35_s26), 0  ;;  %s2269_s27 = smov (!%p36_p0, %s38_s27), %s1877_s24 }
   0x9   : > { %2256 = sst [smem:[#allocation6_spill]] %s2267_s26  ;;  %p484_p3 = pnand %p1566_p1, %p483_p2 }
   0xa   : > { %p40_p4 = scmp.ge.s32.totalorder %s2269_s27, 2  ;;  %p538_p5 = scmp.lt.s32.totalorder (!%p484_p3), %s1869_s22, 1 }
   0xb   : > { %487 = sbr.rel (%p484_p3) target bundleno = 2784 (0xae0), region = 84  ;;  %p545_p6 = scmp.lt.s32.totalorder (!%p484_p3), %s1865_s21, 3 }
   0xc   : > { %s2271_s27 = smov (%p40_p4, %s2269_s27), 0  ;;  %s2258_s20 = sld [smem:[#allocation8_spill]] (!%p484_p3) }
   0xd   : > { %2257 = sst [smem:[#allocation7_spill]] %s2271_s27  ;;  %p1570_p7 = scmp.ne.s32.totalorder (!%p484_p3), %s1865_s21, 0 }
  0x12   : > { %s2273_s22 = smov (!%p538_p5, %s1869_s22), 1  ;;  %557 = sbr.rel (%p1570_p7) target bundleno = 25 (0x19), region = 88 }
  0x13   : > { %s546_s28 = scalar_select %p545_p6, %s1865_s21, 3 }
  0x14   : > { %s1567_s29 = sshll.u32 %s2273_s22, 3  ;;  %s544_s17 = scalar_lea.vmem %s2231_s1, %s2273_s22  ;;  %vm559_vm0 = vcmask (!%p1570_p7), 261120  }
  0x15   : > { %s541_s27 = scalar_lea.vmem %s2258_s20, %s1567_s29  ;;  %s1568_s26 = sshll.u32 %s546_s28, 1 }
  0x16   : > { %s550_s24 = sadd.s32 %s1568_s26, %s2273_s22  ;;  %v558_v0 = vld [vmem:[%s541_s27] sm:$0xff] (!%p1570_p7) }
  0x17   : > { %s1569_s23 = sshll.u32 %s550_s24, 3  ;;  %560 = vst.msk [vmem:[#allocation2] sm:$0xff] (!%p1570_p7), %vm559_vm0, %v558_v0 }
  0x18   : > { %s552_s12 = scalar_lea.vmem %s2246_s16, %s1569_s23 }
  0x19 PF: > { %v1807_v1 = vld [vmem:[%s2244_s14] sm:$0xff]   ;;  %v1883_v2 = vmov 0.0   ;;  %v1808_v3 = vld [vmem:[%s2244_s14 + $0x8] sm:$0xff]   ;;  %vm1884_vm1 = vmmov 0   ;;  %vm586_vm2 = vcmask 261120   ;;  %p1575_p8 = scmp.ge.s32.totalorder %s1865_s21, 3 }
  0x1a   : > { %1649 = vmatprep.subr.bf16.mxu0 %v1883_v2  ;;  %1653 = vmatprep.mubr.msk.bf16.mxu0 %vm1884_vm1, %v1883_v2  ;;  %v1571_v6 = vld [vmem:[%s2245_s15] ss:$0 sm:$0xff]  ;;  %v1885_v13 = vmov (!%p1575_p8), 0.0   ;;  %v1810_v14 = vld [vmem:[%s2232_s2 + $0x8] sm:$0xff] (!%p1575_p8)   ;;  %vm1886_vm3 = vmmov (!%p1575_p8), 0   ;;  %s1887_s18 = smov (!%p1575_p8), 120  }
  0x1b   : > { %1650 = vmatpush3.bf16.msra.mxu0 %v1807_v1  ;;  %v1809_v12 = vld [vmem:[%s2232_s2] sm:$0xff] (!%p1575_p8)   ;;  %1677 = vmatprep.subr.bf16.mxu1 (!%p1575_p8), %v1885_v13  ;;  %s1888_s19 = smov (!%p1575_p8), 96   ;;  %s1889_s20 = smov (!%p1575_p8), 80   ;;  %vm709_vm4 = vcmask (!%p1575_p8), 64512   ;;  %vm773_vm5 = vcmask (!%p1575_p8), 1043456   ;;  %vm1160_vm6 = vcmask (!%p1575_p8), 130048  }
  0x1c   : > { %1651 = vmatprep.subr.bf16.mxu0 %v1883_v2  ;;  %1679 = vmatprep.mubr.msk.bf16.mxu1 (!%p1575_p8), %vm1886_vm3, %v1885_v13  ;;  %v1576_v15 = vld [vmem:[%s2233_s3] ss:$0 sm:$0xff] (!%p1575_p8)  ;;  %s1890_s30 = smov (!%p1575_p8), 88   ;;  %s1891_s0 = smov (!%p1575_p8), 72   ;;  %vm1162_vm7 = vcmask (!%p1575_p8), 195584  }
  0x1d   : > { %s1892_s26 = smov (!%p1575_p8), 112   ;;  %s1893_s24 = smov (!%p1575_p8), 104   ;;  %v1580_v33 = vld [vmem:[%s544_s17] ss:$0 sm:$0xff] (!%p1575_p8) }
  0x1e   : > { %v2041_v4 = vld [vmem:[#allocation2] sm:$0xff]  ;;  %s1894_s22 = smov (!%p1575_p8), 56   ;;  %s1895_s17 = smov (!%p1575_p8), 64  }
  0x1f   : > { %v562_v5 = vpack.c.bf16 %v2041_v4, %v2041_v4  ;;  %1652 = vmatpush3.bf16.msra.mxu0 %v1808_v3  ;;  %s1896_s25 = smov (!%p1575_p8), 40   ;;  %s1897_s27 = smov (!%p1575_p8), 48  }
  0x20   : > { %1657 = vmatprep.subr.bf16.mxu0 (!%p1575_p8), %v1885_v13  ;;  %s1898_s28 = smov (!%p1575_p8), 8  }
  0x22   : > { %1654 = vmatmul.mubr.msk.bf16.vlgmr.msra.gmra.mrb[0].mxu0 %vm586_vm2, %v562_v5 }
  0x23   : > { %1658 = vmatpush3.bf16.msra.mxu0 (!%p1575_p8), %v1809_v12  ;;  %1661 = vmatprep.mubr.msk.bf16.mxu0 (!%p1575_p8), %vm1886_vm3, %v1885_v13 }
  0x24   : > { %1659 = vmatprep.subr.bf16.mxu0 (!%p1575_p8), %v1885_v13 }
  0x27   : > { %1660 = vmatpush3.bf16.msra.mxu0 (!%p1575_p8), %v1810_v14 }
  0x28   : > { %1665 = vmatprep.subr.bf16.mxu0 (!%p1575_p8), %v1885_v13 }
  0xf2   : > { %634 = sbr.rel (%p1575_p8) target bundleno = 2784 (0xae0), region = 92 }
  0xf5   : > { %v624_v7 = vpop.f32.mrb[0].mxu0 }
  0xf6   : > { %v625_v8 = vadd.f32 %v1571_v6, %v624_v7  ;;  %v1655_v9 = vpop.f32.mrb[1].mxu0 }
  0xf7   : > { %v627_v10 = vpop.f32.mrb[2].mxu0 }
  0xf8   : > { %630 = vst [vmem:[%s552_s12] sm:$0xff] %v625_v8  ;;  %v1656_v11 = vpop.f32.mrb[3].mxu0  ;;  %1662 = vmatmul.mubr.msk.bf16.vlgmr.msra.gmra.mrb[0].mxu0 (!%p1575_p8), %vm586_vm2, %v562_v5 }
  0xf9   : > { %1667 = vmatprep.mubr.msk.bf16.mxu0 %vm1886_vm3, %v1885_v13 }
 0x1cb   : > { %v692_v16 = vpop.f32.mrb[0].mxu0 }
 0x1cc   : > { %v693_v17 = vadd.f32 %v1576_v15, %v692_v16  ;;  %v1663_v18 = vpop.f32.mrb[1].mxu0 }
 0x1cd   : > { %v695_v19 = vpop.f32.mrb[2].mxu0 }
 0x1ce   : > { %v2070_v20 = vpack.c.bf16 %v693_v17, %v693_v17  ;;  %v1664_v21 = vpop.f32.mrb[3].mxu0 }
 0x1d0   : > { %817 = vrot.lane.b32.xlu1 %v2070_v20, %s1887_s18  ;;  %707 = vrot.lane.b32.xlu0 %v2070_v20, %s1888_s19  ;;  %s1899_s19 = smov 16  }
 0x1d4   : > { %929 = vrot.lane.b32.xlu1 %v2070_v20, %s1889_s20  ;;  %819 = vrot.lane.b32.xlu0 %v2070_v20, %s1890_s30  ;;  %s1900_s20 = smov 24  }
 0x1d8   : > { %1039 = vrot.lane.b32.xlu1 %v2070_v20, %s1891_s0  ;;  %927 = vrot.lane.b32.xlu0 %v2070_v20, %s1892_s26  ;;  %s2260_s0 = sld [smem:[#allocation10_spill]] }
 0x1dc   : > { %1037 = vrot.lane.b32.xlu0 %v2070_v20, %s1893_s24 }
 0x242   : > { %v708_v22 = vpop.permute.xlu0 %707  ;;  %v818_v24 = vpop.permute.xlu1 %817 }
 0x243   : > { %v714_v23 = vsel %vm709_vm4, %v708_v22, 0 }
 0x244   : > { %1666 = vmatpush3.bf16.xpose.msra.mxu0 %v714_v23 }
 0x245   : > { %1671 = vmatprep.subr.bf16.mxu0 %v1885_v13 }
 0x246   : > { %v820_v25 = vpop.permute.xlu0 %819  ;;  %v930_v27 = vpop.permute.xlu1 %929 }
 0x247   : > { %v825_v26 = vsel %vm709_vm4, %v820_v25, 0  ;;  %v935_v28 = vsel %vm709_vm4, %v930_v27, 0 }
 0x248   : > { %1678 = vmatpush3.bf16.xpose.msra.mxu1 %v825_v26 }
 0x249   : > { %1689 = vmatprep.subr.bf16.mxu1 %v1885_v13 }
 0x24a   : > { %v1040_v29 = vpop.permute.xlu1 %1039  ;;  %v928_v30 = vpop.permute.xlu0 %927 }
 0x24b   : > { %1668 = vmatmul.mubr.msk.bf16.vlgmr.msra.gmra.mrb[4].mxu0 %vm709_vm4, %v2070_v20  ;;  %v1045_v31 = vsel %vm709_vm4, %v1040_v29, 0 }
 0x24c   : > { %1673 = vmatprep.mubr.msk.bf16.mxu0 %vm1886_vm3, %v1885_v13 }
 0x24e   : > { %v1038_v32 = vpop.permute.xlu0 %1037 }
 0x24f   : > { %1680 = vmatmul.mubr.msk.bf16.vlgmr.msra.gmra.mrb[0].mxu1 %vm709_vm4, %v818_v24 }
 0x250   : > { %1690 = vmatpush3.bf16.xpose.msra.mxu1 %v935_v28  ;;  %1691 = vmatprep.mubr.msk.bf16.mxu1 %vm1886_vm3, %v1885_v13 }
 0x251   : > { %1701 = vmatprep.subr.bf16.mxu1 %v1885_v13 }
 0x257   : > { %1692 = vmatmul.mubr.msk.bf16.vlgmr.msra.gmra.mrb[4].mxu1 %vm709_vm4, %v928_v30 }
 0x258   : > { %1702 = vmatpush3.bf16.xpose.msra.mxu1 %v1045_v31  ;;  %1703 = vmatprep.mubr.msk.bf16.mxu1 %vm1886_vm3, %v1885_v13 }
 0x259   : > { %1713 = vmatprep.subr.bf16.mxu1 %v1885_v13 }
 0x25f   : > { %1704 = vmatmul.mubr.msk.bf16.vlgmr.msra.gmra.mrb[8].mxu1 %vm709_vm4, %v1038_v32 }
 0x260   : > { %1717 = vmatprep.mubr.msk.bf16.mxu1 %vm1886_vm3, %v1885_v13 }
 0x31e   : > { %v750_v34 = vpop.f32.mrb[4].mxu0 }
 0x31f   : > { %v751_v35 = vadd.f32 %v1580_v33, %v750_v34  ;;  %v1669_v36 = vpop.f32.mrb[5].mxu0 }
 0x320   : > { %v753_v37 = vpop.f32.mrb[6].mxu0 }
 0x321   : > { %v1670_v38 = vpop.f32.mrb[7].mxu0  ;;  %v756_v39 = vsel %vm709_vm4, %v751_v35, -inf }
 0x322   : > { %v861_v40 = vpop.f32.mrb[0].mxu1  ;;  %757 = vmax.xlane.f32.xlu1 %v756_v39 }
 0x323   : > { %v862_v41 = vadd.f32 %v1580_v33, %v861_v40  ;;  %v1681_v42 = vpop.f32.mrb[1].mxu1 }
 0x324   : > { %v864_v43 = vpop.f32.mrb[2].mxu1 }
 0x325   : > { %v1682_v44 = vpop.f32.mrb[3].mxu1  ;;  %v867_v45 = vsel %vm709_vm4, %v862_v41, -inf }
 0x326   : > { %868 = vmax.xlane.f32.xlu0 %v867_v45 }
 0x32a   : > { %v971_v46 = vpop.f32.mrb[4].mxu1 }
 0x32b   : > { %v972_v47 = vadd.f32 %v1580_v33, %v971_v46  ;;  %v1693_v48 = vpop.f32.mrb[5].mxu1 }
 0x32c   : > { %v974_v49 = vpop.f32.mrb[6].mxu1  ;;  %v1811_v48 = vld [vmem:[%s2234_s4] sm:$0xff]  }
 0x32d   : > { %v1694_v50 = vpop.f32.mrb[7].mxu1  ;;  %v977_v51 = vsel %vm709_vm4, %v972_v47, -inf  ;;  %1714 = vmatpush3.bf16.msra.mxu1 %v1811_v48  ;;  %v1812_v49 = vld [vmem:[%s2234_s4 + $0x8] sm:$0xff]  }
 0x32e   : > { %978 = vmax.xlane.f32.xlu0 %v977_v51  ;;  %1715 = vmatprep.subr.bf16.mxu1 %v1885_v13 }
 0x331   : > { %1716 = vmatpush3.bf16.msra.mxu1 %v1812_v49 }
 0x332   : > { %v1081_v52 = vpop.f32.mrb[8].mxu1  ;;  %1729 = vmatprep.subr.bf16.mxu1 %v1885_v13 }
 0x333   : > { %v1082_v53 = vadd.f32 %v1580_v33, %v1081_v52  ;;  %v1705_v54 = vpop.f32.mrb[9].mxu1 }
 0x334   : > { %v1084_v55 = vpop.f32.mrb[10].mxu1 }
 0x335   : > { %v1706_v56 = vpop.f32.mrb[11].mxu1  ;;  %v1087_v57 = vsel %vm709_vm4, %v1082_v53, -inf }
 0x336   : > { %1088 = vmax.xlane.f32.xlu1 %v1087_v57 }
 0x3af   : > { %v758_v58 = vpop.xlane.xlu1 %757 }
 0x3b0   : > { %v759_v59 = vsub.f32 %v751_v35, %v758_v58 }
 0x3b2   : > { %v760_v60 = vmul.f32 1.442695, %v759_v59 }
 0x3b3   : > { %v869_v61 = vpop.xlane.xlu0 %868 }
 0x3b4   : > { %1823 = vpow2.f32 %v760_v60  ;;  %v870_v62 = vsub.f32 %v862_v41, %v869_v61 }
 0x3b6   : > { %v871_v63 = vmul.f32 1.442695, %v870_v62 }
 0x3b8   : > { %1825 = vpow2.f32 %v871_v63 }
 0x3bb   : > { %v979_v0 = vpop.xlane.xlu0 %978 }
 0x3bc   : > { %v980_v1 = vsub.f32 %v972_v47, %v979_v0 }
 0x3be   : > { %v1824_v2 = vpop.eup %1823  ;;  %v981_v3 = vmul.f32 1.442695, %v980_v1  ;;  %v1589_v1 = vld [vmem:[%s2235_s5] ss:$0 sm:$0xff] }
 0x3bf   : > { %v762_v5 = vsel %vm709_vm4, %v1824_v2, 0.0 }
 0x3c0   : > { %1827 = vpow2.f32 %v981_v3  ;;  %763 = vadd.xlane.f32.xlu0 %v762_v5 }
 0x3c2   : > { %v1826_v6 = vpop.eup %1825 }
 0x3c3   : > { %v873_v7 = vsel %vm709_vm4, %v1826_v6, 0.0  ;;  %v1089_v10 = vpop.xlane.xlu1 %1088 }
 0x3c4   : > { %874 = vadd.xlane.f32.xlu1 %v873_v7  ;;  %v1090_v11 = vsub.f32 %v1082_v53, %v1089_v10 }
 0x3c6   : > { %v1091_v12 = vmul.f32 1.442695, %v1090_v11 }
 0x3c8   : > { %1829 = vpow2.f32 %v1091_v12 }
 0x3ca   : > { %v1828_v8 = vpop.eup %1827 }
 0x3cb   : > { %v983_v9 = vsel %vm709_vm4, %v1828_v8, 0.0 }
 0x3cc   : > { %984 = vadd.xlane.f32.xlu0 %v983_v9 }
 0x3d2   : > { %v1830_v14 = vpop.eup %1829 }
 0x3d3   : > { %v1093_v15 = vsel %vm709_vm4, %v1830_v14, 0.0 }
 0x3d5   : > { %879 = vrot.lane.b32.xlu1 %v2070_v20, %s1894_s22 }
 0x3e2   : > { %768 = vrot.lane.b32.xlu0 %v2070_v20, %s1895_s17 }
 0x3e6   : > { %1099 = vrot.lane.b32.xlu0 %v2070_v20, %s1896_s25 }
 0x3f9   : > { %1094 = vadd.xlane.f32.xlu1 %v1093_v15 }
 0x40a   : > { %989 = vrot.lane.b32.xlu1 %v2070_v20, %s1897_s27 }
 0x44d   : > { %v764_v16 = vpop.xlane.xlu0 %763 }
 0x44e   : > { %1831 = vrcp.f32 %v764_v16  ;;  %v1813_v16 = vld [vmem:[%s2238_s8] sm:$0xff]  }
 0x451   : > { %v875_v17 = vpop.xlane.xlu1 %874 }
 0x452   : > { %1833 = vrcp.f32 %v875_v17  ;;  %v1815_v17 = vld [vmem:[%s2240_s10] sm:$0xff]  }
 0x455   : > { %v880_v24 = vpop.permute.xlu1 %879 }
 0x456   : > { %v885_v27 = vsel %vm773_vm5, %v880_v24, 0 }
 0x458   : > { %v1832_v18 = vpop.eup %1831 }
 0x459   : > { %v985_v19 = vpop.xlane.xlu0 %984  ;;  %v766_v21 = vmul.f32 %v1832_v18, %v1824_v2  ;;  %v1816_v18 = vld [vmem:[%s2240_s10 + $0x8] sm:$0xff]  }
 0x45a   : > { %1835 = vrcp.f32 %v985_v19  ;;  %v1817_v19 = vld [vmem:[%s2240_s10 + $0x10] sm:$0xff]  }
 0x45b   : > { %v767_v25 = vpack.c.bf16 %v766_v21, %v766_v21  ;;  %v1818_v21 = vld [vmem:[%s2240_s10 + $0x18] sm:$0xff]  }
 0x45c   : > { %v1834_v26 = vpop.eup %1833 }
 0x45d   : > { %v769_v22 = vpop.permute.xlu0 %768  ;;  %v877_v20 = vmul.f32 %v1834_v26, %v1826_v6 }
 0x45e   : > { %v775_v23 = vsel %vm773_vm5, %v769_v22, 0  ;;  %v1819_v22 = vld [vmem:[%s2240_s10 + $0x20] sm:$0xff]  }
 0x45f   : > { %1672 = vmatpush3.bf16.msra.mxu0 %v775_v23  ;;  %v878_v28 = vpack.c.bf16 %v877_v20, %v877_v20  ;;  %v1820_v23 = vld [vmem:[%s2240_s10 + $0x28] sm:$0xff]   ;;  %v1593_v20 = vld [vmem:[%s2236_s6] ss:$0 sm:$0xff] }
 0x460   : > { %1683 = vmatprep.subr.bf16.mxu0 %v1885_v13 }
 0x461   : > { %v1100_v34 = vpop.permute.xlu0 %1099 }
 0x462   : > { %1674 = vmatmul.mubr.msk.bf16.vlgmr.msra.gmra.mrb[8].mxu0 %vm709_vm4, %v767_v25  ;;  %v1105_v36 = vsel %vm773_vm5, %v1100_v34, 0  ;;  %v1822_v34 = vld [vmem:[%s2240_s10 + $0x38] sm:$0xff]  }
 0x463   : > { %1684 = vmatpush3.bf16.msra.mxu0 %v885_v27  ;;  %1685 = vmatprep.mubr.msk.bf16.mxu0 %vm1886_vm3, %v1885_v13 }
 0x464   : > { %1695 = vmatprep.subr.bf16.mxu0 %v1885_v13  ;;  %v1836_v29 = vpop.eup %1835 }
 0x465   : > { %v987_v31 = vmul.f32 %v1836_v29, %v1828_v8  ;;  %v1594_v29 = vld [vmem:[%s2237_s7] ss:$0 sm:$0xff] }
 0x467   : > { %v988_v35 = vpack.c.bf16 %v987_v31, %v987_v31 }
 0x46a   : > { %1686 = vmatmul.mubr.msk.bf16.vlgmr.msra.gmra.mrb[12].mxu0 %vm709_vm4, %v878_v28 }
 0x46b   : > { %1697 = vmatprep.mubr.msk.bf16.mxu0 %vm1886_vm3, %v1885_v13 }
 0x486   : > { %v1095_v30 = vpop.xlane.xlu1 %1094 }
 0x487   : > { %1837 = vrcp.f32 %v1095_v30 }
 0x48a   : > { %v990_v32 = vpop.permute.xlu1 %989 }
 0x48b   : > { %v995_v33 = vsel %vm773_vm5, %v990_v32, 0 }
 0x48c   : > { %1696 = vmatpush3.bf16.msra.mxu0 %v995_v33  ;;  %v1821_v33 = vld [vmem:[%s2240_s10 + $0x30] sm:$0xff]  }
 0x48d   : > { %1707 = vmatprep.subr.bf16.mxu0 %v1885_v13 }
 0x48f   : > { %1698 = vmatmul.mubr.msk.bf16.vlgmr.msra.gmra.mrb[16].mxu0 %vm709_vm4, %v988_v35  ;;  %v1595_v35 = vld [vmem:[%s2239_s9] ss:$0 sm:$0xff] }
 0x490   : > { %1708 = vmatpush3.bf16.msra.mxu0 %v1105_v36  ;;  %1709 = vmatprep.mubr.msk.bf16.mxu0 %vm1886_vm3, %v1885_v13 }
 0x491   : > { %v1838_v37 = vpop.eup %1837  ;;  %1721 = vmatprep.subr.bf16.mxu0 %v1885_v13 }
 0x492   : > { %v1097_v38 = vmul.f32 %v1838_v37, %v1830_v14 }
 0x494   : > { %v1098_v39 = vpack.c.bf16 %v1097_v38, %v1097_v38 }
 0x497   : > { %1710 = vmatmul.mubr.msk.bf16.vlgmr.msra.gmra.mrb[20].mxu0 %vm709_vm4, %v1098_v39 }
 0x498   : > { %1725 = vmatprep.mubr.msk.bf16.mxu0 %vm1886_vm3, %v1885_v13  ;;  %1722 = vmatpush3.bf16.msra.mxu0 %v1813_v16 }
 0x499   : > { %1723 = vmatprep.subr.bf16.mxu0 %v1885_v13 }
 0x535   : > { %v811_v40 = vpop.f32.mrb[8].mxu0 }
 0x536   : > { %v1675_v41 = vpop.f32.mrb[9].mxu0 }
 0x537   : > { %v814_v42 = vpop.f32.mrb[10].mxu0 }
 0x538   : > { %v1676_v43 = vpop.f32.mrb[11].mxu0 }
 0x53d   : > { %v921_v44 = vpop.f32.mrb[12].mxu0 }
 0x53e   : > { %1148 = vrot.lane.b32.xlu1 %v921_v44, %s1898_s28  ;;  %v1687_v45 = vpop.f32.mrb[13].mxu0 }
 0x53f   : > { %v924_v46 = vpop.f32.mrb[14].mxu0 }
 0x540   : > { %v1688_v47 = vpop.f32.mrb[15].mxu0 }
 0x562   : > { %v1031_v50 = vpop.f32.mrb[16].mxu0 }
 0x563   : > { %1152 = vrot.lane.b32.xlu0 %v1031_v50, %s1899_s19  ;;  %v1699_v51 = vpop.f32.mrb[17].mxu0  ;;  %s2259_s19 = sld [smem:[#allocation9_spill]] }
 0x564   : > { %v1034_v52 = vpop.f32.mrb[18].mxu0 }
 0x565   : > { %v1700_v53 = vpop.f32.mrb[19].mxu0 }
 0x56a   : > { %v1141_v54 = vpop.f32.mrb[20].mxu0 }
 0x56b   : > { %1156 = vrot.lane.b32.xlu1 %v1141_v54, %s1900_s20  ;;  %v1711_v55 = vpop.f32.mrb[21].mxu0 }
 0x56c   : > { %v1144_v56 = vpop.f32.mrb[22].mxu0 }
 0x56d   : > { %v1712_v57 = vpop.f32.mrb[23].mxu0 }
 0x5b0   : > { %v1149_v58 = vpop.permute.xlu1 %1148 }
 0x5b1   : > { %v1159_v60 = vsel %vm709_vm4, %v811_v40, %v1149_v58 }
 0x5d5   : > { %v1153_v59 = vpop.permute.xlu0 %1152 }
 0x5d6   : > { %v1161_v61 = vsel %vm1160_vm6, %v1159_v60, %v1153_v59  ;;  %v1608_v59 = vld [vmem:[%s2259_s19] ss:$0 sm:$0xff] }
 0x5dd   : > { %v1157_v62 = vpop.permute.xlu1 %1156 }
 0x5de   : > { %v1163_v63 = vsel %vm1162_vm7, %v1161_v61, %v1157_v62  ;;  %v1609_v61 = vld [vmem:[%s2260_s0] ss:$0 sm:$0xff] }
 0x5df   : > { %v1164_v0 = vpack.c.bf16 %v1163_v63, %v1163_v63 }
 0x5e1   : > { %1718 = vmatmul.mubr.msk.bf16.vlgmr.msra.gmra.mrb[12].mxu1 %vm586_vm2, %v1164_v0 }
 0x5e2   : > { %1745 = vmatprep.mubr.msk.bf16.mxu1 %vm1886_vm3, %v1885_v13  ;;  %1730 = vmatpush3.bf16.msra.mxu1 %v1815_v17 }
 0x5e3   : > { %1731 = vmatprep.subr.bf16.mxu1 %v1885_v13 }
 0x5e6   : > { %1732 = vmatpush3.bf16.msra.mxu1 %v1816_v18 }
 0x5e7   : > { %1733 = vmatprep.subr.bf16.mxu1 %v1885_v13 }
 0x5ea   : > { %1734 = vmatpush3.bf16.msra.mxu1 %v1817_v19 }
 0x5eb   : > { %1735 = vmatprep.subr.bf16.mxu1 %v1885_v13 }
 0x5ee   : > { %1736 = vmatpush3.bf16.msra.mxu1 %v1818_v21 }
 0x5ef   : > { %1737 = vmatprep.subr.bf16.mxu1 %v1885_v13 }
 0x5f2   : > { %1738 = vmatpush3.bf16.msra.mxu1 %v1819_v22 }
 0x5f3   : > { %1739 = vmatprep.subr.bf16.mxu1 %v1885_v13 }
 0x5f6   : > { %1740 = vmatpush3.bf16.msra.mxu1 %v1820_v23 }
 0x5f7   : > { %1741 = vmatprep.subr.bf16.mxu1 %v1885_v13 }
 0x5fa   : > { %1742 = vmatpush3.bf16.msra.mxu1 %v1821_v33 }
 0x5fb   : > { %1743 = vmatprep.subr.bf16.mxu1 %v1885_v13  ;;  %v1599_v13 = vld [vmem:[%s2241_s11] ss:$0 sm:$0xff] }
 0x5fe   : > { %1744 = vmatpush3.bf16.msra.mxu1 %v1822_v34 }
 0x6b4   : > { %v1225_v2 = vpop.f32.mrb[12].mxu1 }
 0x6b5   : > { %v1226_v3 = vadd.f32 %v1589_v1, %v1225_v2  ;;  %v1719_v5 = vpop.f32.mrb[13].mxu1 }
 0x6b6   : > { %v1228_v6 = vpop.f32.mrb[14].mxu1 }
 0x6b7   : > { %v1231_v7 = vadd.f32 %v1226_v3, %v2041_v4  ;;  %v1720_v8 = vpop.f32.mrb[15].mxu1  ;;  %v1814_v4 = vld [vmem:[%s2238_s8 + $0x8] sm:$0xff]  }
 0x6b8   : > { %1724 = vmatpush3.bf16.msra.mxu0 %v1814_v4 }
 0x6b9   : > { %v1234_v9 = vsel %vm586_vm2, %v1231_v7, 0.0 }
 0x6ba   : > { %1235 = vadd.xlane.f32.xlu0 %v1234_v9 }
 0x747   : > { %v1236_v10 = vpop.xlane.xlu0 %1235 }
 0x748   : > { %v1238_v11 = vmul.f32 0.03125, %v1236_v10 }
 0x74a   : > { %v1239_v12 = vsub.f32 %v1231_v7, %v1238_v11 }
 0x74c   : > { %v1240_v14 = vmul.f32 %v1239_v12, %v1239_v12 }
 0x74e   : > { %v1241_v15 = vsel %vm586_vm2, %v1240_v14, 0.0 }
 0x74f   : > { %1242 = vadd.xlane.f32.xlu1 %v1241_v15 }
 0x7dc   : > { %v1243_v24 = vpop.xlane.xlu1 %1242 }
 0x7dd   : > { %v1244_v25 = vmul.f32 0.03125, %v1243_v24 }
 0x7df   : > { %v1245_v26 = vadd.f32 1e-05, %v1244_v25 }
 0x7e1   : > { %1839 = vrsqrt.f32 %v1245_v26 }
 0x7eb   : > { %v1840_v27 = vpop.eup %1839 }
 0x7ec   : > { %v1247_v28 = vmul.f32 %v1840_v27, %v1239_v12 }
 0x7ee   : > { %v1254_v30 = vmul.f32 %v1593_v20, %v1247_v28 }
 0x7f0   : > { %v1261_v31 = vadd.f32 %v1594_v29, %v1254_v30 }
 0x7f2   : > { %v1262_v32 = vpack.c.bf16 %v1261_v31, %v1261_v31 }
 0x7f4   : > { %1726 = vmatmul.mubr.msk.bf16.vlgmr.msra.gmra.mrb[24].mxu0 %vm586_vm2, %v1262_v32 }
 0x8c7   : > { %v1323_v36 = vpop.f32.mrb[24].mxu0 }
 0x8c8   : > { %v1324_v37 = vadd.f32 %v1595_v35, %v1323_v36  ;;  %v1727_v38 = vpop.f32.mrb[25].mxu0 }
 0x8c9   : > { %v1326_v39 = vpop.f32.mrb[26].mxu0 }
 0x8ca   : > { %v1329_v40 = vmax.f32 %v1324_v37, 0.0  ;;  %v1728_v41 = vpop.f32.mrb[27].mxu0 }
 0x8cc   : > { %v1330_v42 = vpack.c.bf16 %v1329_v40, %v1329_v40 }
 0x8ce   : > { %1746 = vmatmul.mubr.bf16.vlgmr.msra.gmra.mrb[16].mxu1 %v1330_v42 }
 0x9a1   : > { %v1436_v43 = vpop.f32.mrb[16].mxu1 }
 0x9a2   : > { %v1437_v44 = vadd.f32 %v1599_v13, %v1436_v43  ;;  %v1747_v45 = vpop.f32.mrb[17].mxu1 }
 0x9a3   : > { %v1439_v46 = vpop.f32.mrb[18].mxu1 }
 0x9a4   : > { %v1748_v47 = vpop.f32.mrb[19].mxu1  ;;  %v1442_v48 = vadd.f32 %v1437_v44, %v1261_v31 }
 0x9a6   : > { %v1445_v49 = vsel %vm586_vm2, %v1442_v48, 0.0 }
 0x9a7   : > { %1446 = vadd.xlane.f32.xlu0 %v1445_v49 }
 0xa34   : > { %v1447_v50 = vpop.xlane.xlu0 %1446 }
 0xa35   : > { %v1448_v51 = vmul.f32 0.03125, %v1447_v50 }
 0xa37   : > { %v1449_v52 = vsub.f32 %v1442_v48, %v1448_v51 }
 0xa39   : > { %v1450_v53 = vmul.f32 %v1449_v52, %v1449_v52 }
 0xa3b   : > { %v1451_v54 = vsel %vm586_vm2, %v1450_v53, 0.0 }
 0xa3c   : > { %1452 = vadd.xlane.f32.xlu0 %v1451_v54 }
 0xac9   : > { %v1453_v55 = vpop.xlane.xlu0 %1452 }
 0xaca   : > { %v1454_v56 = vmul.f32 0.03125, %v1453_v55 }
 0xacc   : > { %v1455_v57 = vadd.f32 1e-05, %v1454_v56 }
 0xace   : > { %1841 = vrsqrt.f32 %v1455_v57 }
 0xad8   : > { %v1842_v58 = vpop.eup %1841 }
 0xad9   : > { %v1457_v60 = vmul.f32 %v1842_v58, %v1449_v52 }
 0xadb   : > { %v1464_v62 = vmul.f32 %v1608_v59, %v1457_v60 }
 0xadd   : > { %v1471_v63 = vadd.f32 %v1609_v61, %v1464_v62 }
 0xadf   : > { %1472 = vst.msk [vmem:[#allocation2] sm:$0xff] %vm586_vm2, %v1471_v63 }
 0xae0 PF: > { %s2261_s26 = sld [smem:[#allocation5_spill]]  ;;  %s2262_s21 = sld [smem:[#allocation3_spill]] }
 0xae1   : > { %s2263_s22 = sld [smem:[#allocation4_spill]]  ;;  %s2264_s23 = sld [smem:[#allocation6_spill]] }
 0xae2   : > { %s2265_s24 = sld [smem:[#allocation7_spill]] }
 0xae6   : > { %s26_s25 = sadd.s32 1, %s2261_s26  }
 0xae7   : > { %p23_p9 = scmp.ge.s32.totalorder %s26_s25, 10  }
 0xae9   :  { %25 = sbr.rel (!%p23_p9) target bundleno = 4 (0x4), region = 125 }

</bundles_post_ra>
